<compile_context>
chip_gen: v5e
topology: v5e:2x2
jax: 0.10.0
libtpu: 0.0.40
codegen_flags: <defaults>
</compile_context>

<pallas_src>
import jax
import jax.numpy as jnp
from jax.experimental import pallas as pl
from jax.experimental.pallas import tpu as pltpu


def _copy_kernel(x_ref, o_ref):
    # Straight lane-dense VMEM tile copy.
    o_ref[...] = x_ref[...]


def _choose_tiles(b, f, itemsize, max_tile_bytes):
    """Pick a (TB, TF) tile: last dim as large & lane-aligned as possible."""
    max_tile_elems = max(1, max_tile_bytes // itemsize)

    if f % 128 == 0:
        # Largest multiple of 128 that leaves room for at least 8 sublane rows.
        tf_cap = max(128, ((max_tile_elems // 8) // 128) * 128)
        tf = min(f, tf_cap)
    else:
        # Full last dim is always a legal block (equal to the array dim).
        tf = f

    rows_budget = max(1, max_tile_elems // tf)
    if b <= rows_budget:
        tb = b                      # full dim -> always legal
    else:
        tb = max(8, (rows_budget // 8) * 8)   # multiple of 8 for sublane tiling
    return tb, tf


def unflatten(x, block_size, *, max_tile_bytes=4 * 1024 * 1024):
    """Pallas implementation of UnFlatten(block_size)(x).

    x: (B, ...) array whose trailing dims flatten to C * block_size**2.
    returns: (B, C, block_size, block_size), same dtype as x.
    """
    b = x.shape[0]
    flat = x.reshape(b, -1)                      # glue: matches torch .view()
    f = flat.shape[1]
    assert f % (block_size * block_size) == 0, "features not divisible by block_size**2"
    c = f // (block_size * block_size)

    itemsize = jnp.dtype(x.dtype).itemsize
    tb, tf = _choose_tiles(b, f, itemsize, max_tile_bytes)

    grid = (pl.cdiv(b, tb), pl.cdiv(f, tf))

    flat_out = pl.pallas_call(
        _copy_kernel,
        out_shape=jax.ShapeDtypeStruct((b, f), x.dtype),
        grid=grid,
        in_specs=[pl.BlockSpec((tb, tf), lambda i, j: (i, j))],
        out_specs=pl.BlockSpec((tb, tf), lambda i, j: (i, j)),
        compiler_params=pltpu.CompilerParams(
            dimension_semantics=("parallel", "parallel"),
            # Safe on all of v5e (128 MiB), v6e (128 MiB), v7x (64 MiB phys).
            vmem_limit_bytes=32 * 1024 * 1024,
        ),
    )(flat)

    # Metadata-only reshape to the PyTorch output layout (free in XLA).
    return flat_out.reshape(b, c, block_size, block_size)


if __name__ == "__main__":
    block_size = 16
    B, C = 2, 4
    F = C * block_size * block_size  # 1024

    key = jax.random.PRNGKey(0)
    x = jax.random.normal(key, (B, F), dtype=jnp.float32)

    y = unflatten(x, block_size)
    y = jax.block_until_ready(y)

    # Reference: exactly what torch's x.view(B, -1, bs, bs) would produce.
    y_ref = x.reshape(B, -1, block_size, block_size)

    assert y.shape == (B, C, block_size, block_size), y.shape
    assert y.dtype == x.dtype
    assert bool(jnp.array_equal(y, y_ref))

    print("KERNEL_OK")
</pallas_src>

<mosaic_0001>
module attributes {stable_mosaic.version = 11 : i64} {
  func.func @_copy_kernel(%arg0: i32, %arg1: i32, %arg2: memref<2x1024xf32, #tpu.memory_space<vmem>>, %arg3: memref<2x1024xf32, #tpu.memory_space<vmem>>) attributes {dimension_semantics = [#tpu.dimension_semantics<parallel>, #tpu.dimension_semantics<parallel>], iteration_bounds = array<i64: 1, 1>, scalar_prefetch = 0 : i64, scratch_operands = 0 : i64, tpu.core_type = #tpu.core_type<tc>, window_params = [{transform_indices = @transform_0, window_bounds = array<i64: 2, 1024>}, {transform_indices = @transform_1, window_bounds = array<i64: 2, 1024>}]} {
    %c0 = arith.constant 0 : index
    %c0_0 = arith.constant 0 : index
    %0 = vector.load %arg2[%c0, %c0_0] : memref<2x1024xf32, #tpu.memory_space<vmem>>, vector<2x1024xf32>
    %c0_1 = arith.constant 0 : index
    %c0_2 = arith.constant 0 : index
    %1 = vector.load %arg3[%c0_1, %c0_2] : memref<2x1024xf32, #tpu.memory_space<vmem>>, vector<2x1024xf32>
    tpu.vector_store %arg3[%c0_1, %c0_2], %0 {strides = array<i32>} : memref<2x1024xf32, #tpu.memory_space<vmem>>, vector<2x1024xf32>,
    return
  }
  func.func @transform_0(%arg0: i32, %arg1: i32) -> (i32, i32) {
    %c0_i32 = arith.constant 0 : i32
    return %arg0, %arg1 : i32, i32
  }
  func.func @transform_1(%arg0: i32, %arg1: i32) -> (i32, i32) {
    %c0_i32 = arith.constant 0 : i32
    return %arg0, %arg1 : i32, i32
  }
}

</mosaic_0001>

<bundles_post_ra>
// kernel: tpu_custom_call.1
= control target key start
LH: loop header
LB: loop body
LE: loop exit
PB: predicated region body
PF: predicated region fallthrough
CT: control target
= control target key end

     0   :  { %6 = vsyncpa [#allocation3], 0  ;;  %s116_s0 = inlined_call_operand.hbm [shape: f32[2,1024], index: 0, kind: input, shape index: {}]   ;;  %s117_s1 = inlined_call_operand.hbm [shape: f32[2,1024], index: 1, kind: output, shape index: {}]  }
   0x1   :  { %7 = vsyncpa [#allocation4], 0  ;;  %s13_s8 = sshll.u32 %s116_s0, 4  ;;  %s98_s9 = smov [#allocation2]   ;;  %s14_s8 = int_to_ptr.hbm [resolvable:$true] %s13_s8 }
   0x2   :  { %s15_s10 = sshll.u32 %s98_s9, 4  ;;  %s16_s10 = int_to_ptr.vmem [resolvable:$true] %s15_s10 }
   0x3   :  { %18 = dma.hbm_to_vmem [thread:$0]  %s14_s8, 256, %s16_s10, [#allocation3]  }
   0x4   :  { %94 = dma.done.wait [#allocation3], 256  }
   0x5   :  { %95 = vsyncadd [#allocation3], 4294967040  ;;  %s99_s11 = smov [#allocation5]   ;;  %s34_s15 = sshll.u32 %s117_s1, 4  ;;  %v23_v0 = vld [vmem:[#allocation2] sm:$0xff]  ;;  %v24_v1 = vld [vmem:[#allocation2 + $0x8] sm:$0xff]  ;;  %s35_s15 = int_to_ptr.hbm [resolvable:$true] %s34_s15 }
   0x6   :  { %s32_s12 = sshll.u32 %s99_s11, 4  ;;  %25 = vst [vmem:[#allocation5] sm:$0xff] %v23_v0  ;;  %s33_s12 = int_to_ptr.vmem [resolvable:$true] %s32_s12 }
   0x7   :  { %26 = vst [vmem:[#allocation5 + $0x8] sm:$0xff] %v24_v1 }
   0x8   :  { %37 = dma.vmem_to_hbm [thread:$0]  %s33_s12, 256, %s35_s15, [#allocation4]  }
   0x9   :  { %96 = dma.done.wait [#allocation4], 256  }
   0xa   :  { %97 = vsyncadd [#allocation4], 4294967040 }
   0xb   :  { %42 = vsyncpa [#allocation3], 1 }
   0xc   :  { %43 = vsyncpa [#allocation4], 1 }

</bundles_post_ra>
